<compile_context>
chip_gen: v7x
topology: tpu7x:2x2x1
jax: 0.10.0
libtpu: 0.0.40
codegen_flags: <defaults>
</compile_context>

<pallas_src>
import functools

import jax
import jax.numpy as jnp
from jax.experimental import pallas as pl
from jax.experimental.pallas import tpu as pltpu


def _rope_default_init(head_dim: int, rope_theta: float):
    """Default rope init: inv_freq = 1 / theta^(2i/d), attention_scaling = 1.0."""
    inv_freq = 1.0 / (
        rope_theta ** (jnp.arange(0, head_dim, 2, dtype=jnp.float32) / head_dim)
    )
    attention_scaling = 1.0
    return inv_freq, attention_scaling


def _rope_kernel(pos_ref, inv_ref, cos_ref, sin_ref, *, attention_scaling):
    # pos_ref: (1, tS, 1) int32   -- one seq-tile of one batch row (sublane-major)
    # inv_ref: (1, half) f32      -- inv_freq (resident, shared by every tile)
    # cos_ref/sin_ref: (1, tS, D) -- outputs in x.dtype
    pos = pos_ref[...].astype(jnp.float32)          # int32 -> f32 in-kernel (VPU filler)
    inv = inv_ref[...]                              # (1, half) f32
    tS = pos.shape[1]
    half = inv.shape[1]

    # Outer product: positions broadcast across lanes, inv_freq across sublanes.
    freqs = pos.reshape(tS, 1) * inv                # (tS, half) f32

    # Half-width transcendentals: cos(cat(f,f)) == cat(cos(f),cos(f)).
    c = jnp.cos(freqs)
    s = jnp.sin(freqs)
    if attention_scaling != 1.0:                    # trace-time constant; skip when 1.0
        c = c * attention_scaling
        s = s * attention_scaling
    c = c.astype(cos_ref.dtype)
    s = s.astype(sin_ref.dtype)

    # Duplicate the *result* and issue one lane-dense, unmasked store per output.
    cos_ref[...] = jnp.concatenate([c, c], axis=-1).reshape(1, tS, 2 * half)
    sin_ref[...] = jnp.concatenate([s, s], axis=-1).reshape(1, tS, 2 * half)


def qwen2_rotary_embedding(x, position_ids, inv_freq, attention_scaling=1.0,
                           seq_tile=None):
    """
    x: (B, H, S, D) array -- only used for its dtype (matches PyTorch forward).
    position_ids: (B, S) integer positions.
    inv_freq: (half,) f32.
    Returns (cos, sin), each (B, S, D) in x.dtype.
    """
    B, S = position_ids.shape
    half = inv_freq.shape[0]
    D = 2 * half
    out_dtype = x.dtype
    attention_scaling = float(attention_scaling)

    # Sequence-tile choice: full-S block for short sequences; bounded tiles for
    # long prefill so per-step VMEM stays small (v7x has only 64 MiB) and the
    # HBM writeback pipelines across grid steps.
    if seq_tile is None:
        tS = S if S <= 1024 else 1024
    else:
        tS = min(int(seq_tile), S)
    if tS < S:
        assert tS % 8 == 0, "sequence tile must be a multiple of 8 when tiling"
    S_pad = pl.cdiv(S, tS) * tS

    pos = position_ids.astype(jnp.int32)
    if S_pad != S:
        pos = jnp.pad(pos, ((0, 0), (0, S_pad - S)))
    # Pre-shape so the sequence axis lands on sublanes inside the tile
    # (avoids an in-kernel lane->sublane relayout).
    pos3 = pos.reshape(B, S_pad, 1)
    inv_2d = inv_freq.reshape(1, half).astype(jnp.float32)

    kernel = functools.partial(_rope_kernel, attention_scaling=attention_scaling)

    out_bytes = jnp.dtype(out_dtype).itemsize
    cost = pl.CostEstimate(
        flops=B * S_pad * half
        + (2 * B * S_pad * D if attention_scaling != 1.0 else 0),
        transcendentals=2 * B * S_pad * half,
        bytes_accessed=2 * B * S_pad * D * out_bytes + 4 * B * S_pad + 4 * half,
    )

    cos, sin = pl.pallas_call(
        kernel,
        out_shape=(
            jax.ShapeDtypeStruct((B, S_pad, D), out_dtype),
            jax.ShapeDtypeStruct((B, S_pad, D), out_dtype),
        ),
        grid_spec=pltpu.PrefetchScalarGridSpec(
            num_scalar_prefetch=0,
            grid=(B, S_pad // tS),
            in_specs=[
                pl.BlockSpec((1, tS, 1), lambda b, s: (b, s, 0)),   # position tile
                pl.BlockSpec((1, half), lambda b, s: (0, 0)),       # inv_freq (resident)
            ],
            out_specs=[
                pl.BlockSpec((1, tS, D), lambda b, s: (b, s, 0)),   # cos
                pl.BlockSpec((1, tS, D), lambda b, s: (b, s, 0)),   # sin
            ],
        ),
        compiler_params=pltpu.CompilerParams(
            dimension_semantics=("parallel", "parallel"),
        ),
        cost_estimate=cost,
    )(pos3, inv_2d)

    if S_pad != S:
        cos = cos[:, :S, :]
        sin = sin[:, :S, :]
    return cos, sin


def _reference(x, position_ids, inv_freq, attention_scaling):
    # Pure-JAX reference mirroring the PyTorch forward exactly.
    pos = position_ids.astype(jnp.float32)                     # (B, S)
    freqs = pos[:, :, None] * inv_freq[None, None, :]          # (B, S, half)
    emb = jnp.concatenate([freqs, freqs], axis=-1)             # (B, S, D)
    cos = (jnp.cos(emb) * attention_scaling).astype(x.dtype)
    sin = (jnp.sin(emb) * attention_scaling).astype(x.dtype)
    return cos, sin


if __name__ == "__main__":
    key = jax.random.PRNGKey(0)

    # Small config consistent with the module's forward:
    #   head_dim = 32, batch = 2, seq = 8, heads = 4.
    B, H, S, head_dim = 2, 4, 8, 32
    rope_theta = 10000.0

    inv_freq, attention_scaling = _rope_default_init(head_dim, rope_theta)

    kx, kp = jax.random.split(key)
    x = jax.random.normal(kx, (B, H, S, head_dim), dtype=jnp.float32)
    position_ids = jnp.broadcast_to(jnp.arange(S, dtype=jnp.int32), (B, S))

    cos, sin = qwen2_rotary_embedding(x, position_ids, inv_freq, attention_scaling)
    cos, sin = jax.block_until_ready((cos, sin))

    cos_ref, sin_ref = _reference(x, position_ids, inv_freq, attention_scaling)

    assert cos.shape == (B, S, head_dim) and sin.shape == (B, S, head_dim)
    assert cos.dtype == x.dtype and sin.dtype == x.dtype
    assert jnp.allclose(cos, cos_ref, atol=1e-5, rtol=1e-5)
    assert jnp.allclose(sin, sin_ref, atol=1e-5, rtol=1e-5)

    # Second small check that exercises the multi-tile (B, S/tS) grid path.
    S2 = 32
    x2 = jax.random.normal(kp, (B, H, S2, head_dim), dtype=jnp.float32)
    position_ids2 = jnp.broadcast_to(jnp.arange(S2, dtype=jnp.int32), (B, S2))
    cos2, sin2 = qwen2_rotary_embedding(
        x2, position_ids2, inv_freq, attention_scaling, seq_tile=8)
    cos2, sin2 = jax.block_until_ready((cos2, sin2))
    cos2_ref, sin2_ref = _reference(x2, position_ids2, inv_freq, attention_scaling)
    assert cos2.shape == (B, S2, head_dim) and sin2.shape == (B, S2, head_dim)
    assert jnp.allclose(cos2, cos2_ref, atol=1e-5, rtol=1e-5)
    assert jnp.allclose(sin2, sin2_ref, atol=1e-5, rtol=1e-5)

    print("KERNEL_OK")
</pallas_src>

<mosaic_0001>
module attributes {stable_mosaic.version = 11 : i64} {
  func.func @_rope_kernel(%arg0: i32, %arg1: i32, %arg2: memref<1x8x1xi32, #tpu.memory_space<vmem>>, %arg3: memref<1x16xf32, #tpu.memory_space<vmem>>, %arg4: memref<1x8x32xf32, #tpu.memory_space<vmem>>, %arg5: memref<1x8x32xf32, #tpu.memory_space<vmem>>) attributes {dimension_semantics = [#tpu.dimension_semantics<parallel>, #tpu.dimension_semantics<parallel>], iteration_bounds = array<i64: 2, 1>, scalar_prefetch = 0 : i64, scratch_operands = 0 : i64, tpu.core_type = #tpu.core_type<tc>, window_params = [{transform_indices = @transform_0, window_bounds = array<i64: 1, 8, 1>}, {pipeline_mode = #tpu.pipeline_mode<synchronous>, transform_indices = @transform_1, window_bounds = array<i64: 1, 16>}, {transform_indices = @transform_2, window_bounds = array<i64: 1, 8, 32>}, {transform_indices = @transform_3, window_bounds = array<i64: 1, 8, 32>}]} {
    %c0 = arith.constant 0 : index
    %c0_0 = arith.constant 0 : index
    %c0_1 = arith.constant 0 : index
    %0 = vector.load %arg2[%c0, %c0_0, %c0_1] : memref<1x8x1xi32, #tpu.memory_space<vmem>>, vector<1x8x1xi32>
    %1 = arith.sitofp %0 : vector<1x8x1xi32> to vector<1x8x1xf32>
    %c0_2 = arith.constant 0 : index
    %c0_3 = arith.constant 0 : index
    %2 = vector.load %arg3[%c0_2, %c0_3] : memref<1x16xf32, #tpu.memory_space<vmem>>, vector<1x16xf32>
    %3 = vector.shape_cast %1 : vector<1x8x1xf32> to vector<8x1xf32>
    %4 = vector.broadcast %3 : vector<8x1xf32> to vector<8x16xf32>
    %5 = vector.broadcast %2 : vector<1x16xf32> to vector<8x16xf32>
    %6 = arith.mulf %4, %5 : vector<8x16xf32>
    %7 = math.cos %6 : vector<8x16xf32>
    %8 = math.sin %6 : vector<8x16xf32>
    %9 = tpu.concatenate %7, %7 in 1 : vector<8x16xf32>, vector<8x16xf32> -> vector<8x32xf32>
    %10 = vector.shape_cast %9 : vector<8x32xf32> to vector<1x8x32xf32>
    %c0_4 = arith.constant 0 : index
    %c0_5 = arith.constant 0 : index
    %c0_6 = arith.constant 0 : index
    %11 = vector.load %arg4[%c0_4, %c0_5, %c0_6] : memref<1x8x32xf32, #tpu.memory_space<vmem>>, vector<1x8x32xf32>
    tpu.vector_store %arg4[%c0_4, %c0_5, %c0_6], %10 {strides = array<i32>} : memref<1x8x32xf32, #tpu.memory_space<vmem>>, vector<1x8x32xf32>,
    %12 = tpu.concatenate %8, %8 in 1 : vector<8x16xf32>, vector<8x16xf32> -> vector<8x32xf32>
    %13 = vector.shape_cast %12 : vector<8x32xf32> to vector<1x8x32xf32>
    %c0_7 = arith.constant 0 : index
    %c0_8 = arith.constant 0 : index
    %c0_9 = arith.constant 0 : index
    %14 = vector.load %arg5[%c0_7, %c0_8, %c0_9] : memref<1x8x32xf32, #tpu.memory_space<vmem>>, vector<1x8x32xf32>
    tpu.vector_store %arg5[%c0_7, %c0_8, %c0_9], %13 {strides = array<i32>} : memref<1x8x32xf32, #tpu.memory_space<vmem>>, vector<1x8x32xf32>,
    return
  }
  func.func @transform_0(%arg0: i32, %arg1: i32) -> (i32, i32, i32) {
    %c0_i32 = arith.constant 0 : i32
    %c0_i32_0 = arith.constant 0 : i32
    return %arg0, %arg1, %c0_i32 : i32, i32, i32
  }
  func.func @transform_1(%arg0: i32, %arg1: i32) -> (i32, i32) {
    %c0_i32 = arith.constant 0 : i32
    %c0_i32_0 = arith.constant 0 : i32
    %c0_i32_1 = arith.constant 0 : i32
    return %c0_i32, %c0_i32_0 : i32, i32
  }
  func.func @transform_2(%arg0: i32, %arg1: i32) -> (i32, i32, i32) {
    %c0_i32 = arith.constant 0 : i32
    %c0_i32_0 = arith.constant 0 : i32
    return %arg0, %arg1, %c0_i32 : i32, i32, i32
  }
  func.func @transform_3(%arg0: i32, %arg1: i32) -> (i32, i32, i32) {
    %c0_i32 = arith.constant 0 : i32
    %c0_i32_0 = arith.constant 0 : i32
    return %arg0, %arg1, %c0_i32 : i32, i32, i32
  }
}

</mosaic_0001>

<bundles_post_ra>
// kernel: tpu_custom_call.1
= control target key start
LH: loop header
LB: loop body
LE: loop exit
PB: predicated region body
PF: predicated region fallthrough
CT: control target
= control target key end

     0   :  { %9 = vsyncpa [#allocation3], 0  ;;  %s989_s0 = inlined_call_operand.vmem [shape: s32[2,8,1], index: 0, kind: input, shape index: {}]   ;;  %s990_s1 = inlined_call_operand.vmem [shape: f32[1,16], index: 1, kind: input, shape index: {}]   ;;  %s991_s2 = inlined_call_operand.hbm [shape: f32[2,8,32], index: 2, kind: output, shape index: {0}]   ;;  %s992_s3 = inlined_call_operand.hbm [shape: f32[2,8,32], index: 3, kind: output, shape index: {1}]  }
   0x1   :  { %11 = vsyncpa [#allocation3 + $0x1], 0 }
   0x2   :  { %12 = vsyncpa [#allocation5], 0 }
   0x3   :  { %14 = vsyncpa [#allocation5 + $0x1], 0  ;;  %s820_s12 = smov 0   ;;  %s822_s13 = smov 0  }
   0x4   :  { %s824_s14 = smov 0   ;;  %s826_s15 = smov 0  }
   0x5   :  { %s828_s16 = smov 0   ;;  %s830_s17 = smov 0  }
   0x6 LB: > { %s578_s18 = sadd.s32 4294967295, %s788_s17   ;;  %s579_s19 = sadd.s32 4294967294, %s788_s17   ;;  %s788_s17 = sphi %s830_s17, %s20_s17   ;;  %s784_s16 = sphi %s828_s16, %s999_s16   ;;  %s780_s15 = sphi %s826_s15, %s998_s15   ;;  %s776_s14 = sphi %s824_s14, %s997_s14   ;;  %s772_s13 = sphi %s822_s13, %s996_s13   ;;  %s768_s12 = sphi %s820_s12, %s995_s12  }
   0x7   : > { %s32_s20 = sadd.s32 1, %s784_s16  ;;  %s90_s21 = sadd.s32 1, %s776_s14 }
   0x8   : > { %p34_p0 = scmp.ge.s32.totalorder %s32_s20, 2  ;;  %p100_p1 = scmp.ne.s32.totalorder %s776_s14, %s772_s13 }
   0x9   : > { %p101_p2 = scmp.eq.s32.totalorder %s578_s18, 1  ;;  %p106_p3 = scmp.ne.s32.totalorder %s772_s13, %s768_s12 }
   0xa   : > { %s1001_s20 = smov (%p34_p0, %s32_s20), 0  ;;  %p107_p5 = scmp.eq.s32.totalorder %s579_s19, 1 }
   0xb   : > { %p860_p4 = por %p101_p2, %p100_p1  ;;  %s85_s23 = ssub.s32 %s784_s16, %s1001_s20 }
   0xc   : > { %p582_p6 = scmp.ge.s32.totalorder %s788_s17, 1  ;;  %p88_p7 = scmp.eq.s32.totalorder %s85_s23, 0 }
   0xd   : > { %p867_p8 = por %p107_p5, %p106_p3  ;;  %p166_p9 = scmp.lt.s32.totalorder %s788_s17, 3 }
   0xe   : > { %s873_s25 = scalar_select %p88_p7, %s776_s14, %s90_s21  }
   0xf   : > { %p167_p10 = pnand %p582_p6, %p166_p9 }
  0x10   : > { %p197_p11 = scmp.lt.s32.totalorder (!%p167_p10), %s780_s15, 1  ;;  %v790_v0 = vmov (!%p167_p10), 0   ;;  %v586_v3 = vld [vmem:[%s990_s1] ss:$0 sm:$0xff] (!%p167_p10)  ;;  %v791_v17 = vmov (!%p167_p10), 2102212464  }
  0x11   : > { %170 = sbr.rel (%p167_p10) target bundleno = 393 (0x189), region = 28  ;;  %673 = vset.pattern.permute.xlu0 (!%p167_p10), %v790_v0  ;;  %v792_v19 = vmov (!%p167_p10), 920167782   ;;  %v793_v23 = vmov (!%p167_p10), 1326507024   ;;  %s797_s6 = smov (!%p167_p10), 16  }
  0x12   : > { %v794_v25 = vmov (!%p167_p10), 683565275   ;;  %v795_v27 = vmov (!%p167_p10), 2475754826   ;;  %v796_v30 = vmov (!%p167_p10), 2131351028  }
  0x13   : > { %s905_s7 = sand.u32 (!%p167_p10), 1, %s772_s13   ;;  %s597_s9 = sshll.u32 (!%p167_p10), %s780_s15, 7 }
  0x14   : > { %s583_s8 = sshll.u32 (!%p167_p10), %s905_s7, 3  ;;  %s919_s28 = scalar_lea.hbm (!%p167_p10), %s992_s3, %s597_s9 }
  0x15   : > { %s189_s10 = scalar_lea.vmem (!%p167_p10), [#allocation2], %s583_s8  ;;  %s196_s18 = scalar_lea.vmem (!%p167_p10), [#allocation4], %s583_s8 }
  0x16   : > { %s460_s11 = sshll.u32 (!%p167_p10), %s189_s10, 4  ;;  %s474_s19 = sshll.u32 (!%p167_p10), %s196_s18, 4  ;;  %s914_s11 = int_to_ptr.vmem [resolvable:$true] %s460_s11  ;;  %s921_s19 = int_to_ptr.vmem [resolvable:$true] %s474_s19 }
  0x17   : > { %s441_s29 = scalar_lea.sflag (!%p167_p10), [#allocation3], %s905_s7  ;;  %s798_s4 = smov (!%p167_p10), [#allocation2]  }
  0x18   : > { %s198_s26 = scalar_select %p197_p11, %s780_s15, 1 }
  0x19   : > { %s682_s5 = sshll.u32 %s798_s4, 4  ;;  %s683_s5 = int_to_ptr.vmem [resolvable:$false] %s682_s5 }
  0x1a   : > { %s585_s27 = sshll.u32 %s198_s26, 3  ;;  %s912_s26 = scalar_lea.hbm %s991_s2, %s597_s9 }
  0x1b   : > { %s203_s30 = scalar_lea.vmem %s989_s0, %s585_s27  ;;  %p685_p1 = scmp.lt.s32.totalorder %s914_s11, %s683_s5 }
  0x1c   : > { %v204_v1 = vld [vmem:[%s203_s30] sm:$0xff]  ;;  %s678_s30 = scalar_lea.vmem %s914_s11, 128 }
  0x1d   : > { %v205_v2 = vcvt.s32.f32 %v204_v1  ;;  %p679_p12 = scmp.ne.s32.totalorder %s914_s11, %s678_s30 }
  0x1f   : > { %209 = vperm.xlu0 %673, %v205_v2   ;;  %p680_p13 = pnand %p679_p12, %p860_p4 }
  0x21   : > { %p681_p0 = pneg %p680_p13 }
  0x9e   : > { %v210_v4 = vpop.permute.xlu0 %209 }
  0x9f   : > { %v883_v5 = vmul.f32 %v586_v3, %v210_v4 }
  0xa1   : > { %v222_v6 = vand.u32 2139095040, %v883_v5  ;;  %v219_v7 = vand.u32 2147483647, %v883_v5  ;;  %vm221_vm7 = vcmp.lt.s32.totalorder %v883_v5, 0  ;;  %vm311_vm15 = vweird.f32 %v883_v5 }
  0xa3   : > { %v223_v8 = vshrl.u32 %v222_v6, 23  ;;  %v226_v10 = vand.u32 8388607, %v219_v7  ;;  %vm220_vm8 = vcmp.le.f32.partialorder %v219_v7, 0.7853982 }
  0xa5   : > { %v587_v9 = vadd.s32 4294967169, %v223_v8  ;;  %v227_v13 = vor.u32 8388608, %v226_v10 }
  0xa7   : > { %v229_v11 = vadd.s32 1, %v587_v9  ;;  %v267_v21 = vshll.u32 %v227_v13, 8 }
  0xa9   : > { %vm230_vm0 = vcmp.gt.s32.totalorder %v229_v11, 0 }
  0xaa   : > { %v231_v12 = vsel %vm230_vm0, %v229_v11, 0  ;;  %vm430_vm0 = vcmask 130048  }
  0xab   : > { %v233_v14 = vand.u32 31, %v231_v12  ;;  %v232_v15 = vshrl.u32 %v231_v12, 5 }
  0xad   : > { %v234_v16 = vsub.s32 32, %v233_v14  ;;  %v245_v18 = vshll.u32 %v791_v17, %v233_v14  ;;  %v248_v20 = vshll.u32 %v792_v19, %v233_v14  ;;  %v236_v26 = vshll.u32 %v794_v25, %v233_v14 }
  0xae   : > { %v239_v29 = vshll.u32 %v795_v27, %v233_v14  ;;  %v242_v32 = vshll.u32 %v796_v30, %v233_v14  ;;  %vm254_vm1 = vcmp.lt.s32.totalorder %v232_v15, 4  ;;  %vm251_vm2 = vcmp.lt.s32.totalorder %v232_v15, 1 }
  0xaf   : > { %v246_v22 = vshrl.u32 %v792_v19, %v234_v16  ;;  %v249_v24 = vshrl.u32 %v793_v23, %v234_v16  ;;  %v237_v28 = vshrl.u32 %v795_v27, %v234_v16  ;;  %v240_v31 = vshrl.u32 %v796_v30, %v234_v16 }
  0xb0   : > { %v243_v33 = vshrl.u32 %v791_v17, %v234_v16  ;;  %v235_v37 = vshrl.u32 %v794_v25, %v234_v16  ;;  %vm252_vm3 = vcmp.lt.s32.totalorder %v232_v15, 2  ;;  %vm253_vm4 = vcmp.lt.s32.totalorder %v232_v15, 3 }
  0xb1   : > { %v247_v34 = vor.u32 %v246_v22, %v245_v18  ;;  %v250_v35 = vor.u32 %v249_v24, %v248_v20  ;;  %v238_v36 = vor.u32 %v237_v28, %v236_v26  ;;  %v241_v38 = vor.u32 %v240_v31, %v239_v29 }
  0xb2   : > { %v244_v39 = vor.u32 %v243_v33, %v242_v32 }
  0xb3   : > { %v260_v40 = vsel %vm254_vm1, %v247_v34, 920167782  ;;  %v264_v41 = vsel %vm254_vm1, %v250_v35, 1326507024  ;;  %v259_v43 = vsel %vm251_vm2, %v238_v36, %v241_v38  ;;  %v255_v46 = vsel %vm251_vm2, %v235_v37, %v238_v36 }
  0xb4   : > { %v256_v42 = vsel %vm254_vm1, %v244_v39, 2102212464  ;;  %v261_v44 = vsel %vm253_vm4, %v244_v39, %v260_v40  ;;  %v263_v45 = vsel %vm251_vm2, %v241_v38, %v244_v39  ;;  %v265_v49 = vsel %vm253_vm4, %v247_v34, %v264_v41 }
  0xb5   : > { %v257_v47 = vsel %vm253_vm4, %v241_v38, %v256_v42  ;;  %v262_v48 = vsel %vm252_vm3, %v259_v43, %v261_v44  ;;  %v266_v50 = vsel %vm252_vm3, %v263_v45, %v265_v49  ;;  %vm432_vm1 = vcmask 261120  }
  0xb6   : > { %v889_v51 = vmul.u32.u64.low %v267_v21, %v262_v48  ;;  %v890_v52 = vmul.u32.u64.high %v267_v21, %v262_v48, %v889_v51  ;;  %v892_v53 = vmul.u32.u64.low %v267_v21, %v266_v50  ;;  %v893_v54 = vmul.u32.u64.high %v267_v21, %v266_v50, %v892_v53 }
  0xb7   : > { %v258_v55 = vsel %vm252_vm3, %v255_v46, %v257_v47 }
  0xb8   : > { %v277_v56 = vadd.s32 1, %v890_v52  ;;  %v274_v57 = vmul.u32 %v267_v21, %v258_v55  ;;  %vm276_vm5 = vc.u32 %v893_v54, %v889_v51  ;;  %v275_v6 = vadd.s32 %v889_v51, %v893_v54 }
  0xba   : > { %v278_v58 = vsel %vm276_vm5, %v277_v56, %v890_v52 }
  0xbb   : > { %v279_v59 = vadd.s32 %v278_v58, %v274_v57 }
  0xbd   : > { %v280_v60 = vadd.s32 536870912, %v279_v59 }
  0xbf   : > { %v281_v61 = vshrl.u32 %v280_v60, 30 }
  0xc1   : > { %v282_v62 = vshll.u32 %v281_v61, 30  ;;  %v305_v19 = vsub.s32 4, %v281_v61 }
  0xc3   : > { %v283_v63 = vsub.s32 %v279_v59, %v282_v62  ;;  %v306_v22 = vsel %vm221_vm7, %v305_v19, %v281_v61 }
  0xc4   : > { %v308_v24 = vsel %vm220_vm8, 0, %v306_v22 }
  0xc5   : > { %v285_v0 = vsub.s32 0, %v283_v63  ;;  %v415_v25 = vadd.s32 3, %v308_v24  ;;  %v312_v27 = vand.u32 3, %v308_v24 }
  0xc7   : > { %v588_v1 = vmin.u32 %v285_v0, %v283_v63  ;;  %v416_v26 = vand.u32 3, %v415_v25  ;;  %vm317_vm10 = vcmp.eq.s32.totalorder %v312_v27, 2  ;;  %vm314_vm12 = vcmp.eq.s32.totalorder %v312_v27, 0 }
  0xc8   : > { %vm313_vm14 = vcmp.lt.s32.totalorder %v312_v27, 2 }
  0xc9   : > { %v287_v2 = vclz %v588_v1  ;;  %vm421_vm9 = vcmp.eq.s32.totalorder %v416_v26, 2  ;;  %vm418_vm11 = vcmp.eq.s32.totalorder %v416_v26, 0  ;;  %vm417_vm13 = vcmp.lt.s32.totalorder %v416_v26, 2 }
  0xcb   : > { %v589_v3 = vadd.s32 4294967294, %v287_v2 }
  0xcd   : > { %vm590_vm6 = vcmp.lt.s32.totalorder %v589_v3, 0 }
  0xce   : > { %v290_v4 = vsel %vm590_vm6, 0, %v589_v3 }
  0xcf   : > { %v291_v8 = vsub.s32 32, %v290_v4  ;;  %v295_v9 = vsub.s32 4294967266, %v290_v4  ;;  %v292_v10 = vshll.u32 %v283_v63, %v290_v4 }
  0xd1   : > { %v293_v11 = vshrl.u32 %v275_v6, %v291_v8  ;;  %v296_v12 = vadd.s32 127, %v295_v9 }
  0xd3   : > { %v294_v13 = vor.u32 %v293_v11, %v292_v10  ;;  %v297_v14 = vshll.u32 %v296_v12, 23 }
  0xd5   : > { %v298_v15 = vor.u32 4788187, %v297_v14  ;;  %v301_v17 = vcvt.s32.f32 %v294_v13 }
  0xd7   : > { %v299_v16 = vand.u32 2147483647, %v298_v15 }
  0xd9   : > { %v302_v18 = vmul.f32 %v301_v17, %v299_v16 }
  0xdb   : > { %v303_v20 = vxor.u32 2147483648, %v302_v18 }
  0xdd   : > { %v304_v21 = vsel %vm221_vm7, %v303_v20, %v302_v18 }
  0xde   : > { %v307_v23 = vsel %vm220_vm8, %v883_v5, %v304_v21 }
  0xdf   : > { %674 = vcosq.f32 %v307_v23 }
  0xe0   : > { %676 = vsinq.f32 %v307_v23 }
  0xe9   : > { %v675_v28 = vpop.eup %674 }
  0xea   : > { %v677_v29 = vpop.eup %676  ;;  %v318_v30 = vxor.u32 2147483648, %v675_v28 }
  0xeb   : > { %v315_v31 = vxor.u32 2147483648, %v677_v29 }
  0xec   : > { %v423_v32 = vsel %vm421_vm9, %v318_v30, %v677_v29  ;;  %v319_v7 = vsel %vm317_vm10, %v318_v30, %v677_v29 }
  0xed   : > { %v420_v33 = vsel %vm418_vm11, %v675_v28, %v315_v31  ;;  %v316_v34 = vsel %vm314_vm12, %v675_v28, %v315_v31 }
  0xee   : > { %v424_v35 = vsel %vm417_vm13, %v420_v33, %v423_v32  ;;  %v320_v36 = vsel %vm313_vm14, %v316_v34, %v319_v7 }
  0xef   : > { %v425_v37 = vsel %vm311_vm15, nan, %v424_v35  ;;  %v321_v38 = vsel %vm311_vm15, nan, %v320_v36 }
  0xf0   : > { %435 = vrot.lane.b32.xlu1 %v425_v37, %s797_s6  ;;  %427 = vrot.lane.b32.xlu0 %v321_v38, %s797_s6  ;;  %s684_s6 = scalar_lea.vmem %s683_s5, 256 }
  0xf1   : > { %p686_p2 = scmp.lt.s32.totalorder %s684_s6, %s678_s30 }
  0xf3   : > { %p687_p3 = por %p686_p2, %p685_p1 }
  0xf5   : > { %p688_p5 = pnand %p687_p3, %p681_p0 }
 0x162   : > { %v436_v5 = vpop.permute.xlu1 %435  ;;  %v428_v39 = vpop.permute.xlu0 %427 }
 0x163   : > { %v438_v40 = vsel %vm430_vm0, %v425_v37, %v436_v5  ;;  %v431_v41 = vsel %vm430_vm0, %v321_v38, %v428_v39 }
 0x164   : > { %433 = vst.msk [vmem:[%s189_s10] sm:$0xff] %vm432_vm1, %v431_v41  ;;  %439 = vst.msk [vmem:[%s196_s18] sm:$0xff] %vm432_vm1, %v438_v40 }
 0x165   : > { %691 = shalt.err (!%p688_p5)
}
 0x166   : > { %s692_s8 = scalar_lea.hbm %s912_s26, 128  ;;  %s696_s18 = scalar_lea.hbm %s991_s2, 256 }
 0x167   : > { %p693_p6 = scmp.ne.s32.totalorder %s912_s26, %s692_s8  ;;  %p697_p10 = scmp.lt.u32.totalorder %s912_s26, %s991_s2 }
 0x168   : > { %p698_p11 = scmp.lt.u32.totalorder %s696_s18, %s692_s8  ;;  %p700_p13 = scmp.lt.u32.totalorder %s692_s8, %s912_s26 }
 0x169   : > { %p694_p7 = pnand %p693_p6, %p860_p4 }
 0x16a   : > { %p699_p12 = por %p698_p11, %p697_p10 }
 0x16b   : > { %p695_p9 = pneg %p694_p7 }
 0x16c   : > { %p701_p0 = por %p700_p13, %p699_p12 }
 0x16e   : > { %p702_p1 = pnand %p701_p0, %p695_p9 }
 0x170   : > { %705 = shalt.err (!%p702_p1)
}
 0x171   : > { %605 = dma.vmem_to_hbm [thread:$0]  (%p860_p4), %s914_s11, 128, %s912_s26, %s441_s29  }
 0x172   : > { %s446_s15 = scalar_lea.sflag [#allocation5], %s905_s7  ;;  %s706_s27 = scalar_lea.vmem %s921_s19, 128 }
 0x173   : > { %p707_p2 = scmp.ne.s32.totalorder %s921_s19, %s706_s27  ;;  %s799_s30 = smov [#allocation4]  }
 0x174   : > { %s710_s4 = sshll.u32 %s799_s30, 4  ;;  %s711_s4 = int_to_ptr.vmem [resolvable:$false] %s710_s4 }
 0x175   : > { %p708_p3 = pnand %p707_p2, %p860_p4  ;;  %s712_s5 = scalar_lea.vmem %s711_s4, 256 }
 0x176   : > { %p713_p6 = scmp.lt.s32.totalorder %s921_s19, %s711_s4  ;;  %p714_p7 = scmp.lt.s32.totalorder %s712_s5, %s706_s27 }
 0x177   : > { %p709_p5 = pneg %p708_p3 }
 0x178   : > { %p715_p9 = por %p714_p7, %p713_p6 }
 0x17a   : > { %p716_p10 = pnand %p715_p9, %p709_p5 }
 0x17c   : > { %719 = shalt.err (!%p716_p10)
}
 0x17d   : > { %s720_s7 = scalar_lea.hbm %s919_s28, 128  ;;  %s724_s29 = scalar_lea.hbm %s992_s3, 256 }
 0x17e   : > { %p721_p11 = scmp.ne.s32.totalorder %s919_s28, %s720_s7  ;;  %p725_p0 = scmp.lt.u32.totalorder %s919_s28, %s992_s3 }
 0x17f   : > { %p726_p1 = scmp.lt.u32.totalorder %s724_s29, %s720_s7  ;;  %p728_p3 = scmp.lt.u32.totalorder %s720_s7, %s919_s28 }
 0x180   : > { %p722_p12 = pnand %p721_p11, %p860_p4 }
 0x181   : > { %p727_p2 = por %p726_p1, %p725_p0 }
 0x182   : > { %p723_p13 = pneg %p722_p12 }
 0x183   : > { %p729_p5 = por %p728_p3, %p727_p2 }
 0x185   : > { %p730_p6 = pnand %p729_p5, %p723_p13 }
 0x187   : > { %733 = shalt.err (!%p730_p6)
}
 0x188   : > { %606 = dma.vmem_to_hbm [thread:$0]  (%p860_p4), %s921_s19, 128, %s919_s28, %s446_s15  }
 0x189 PF: > { %p616_p7 = scmp.ge.s32.totalorder %s788_s17, 2  ;;  %s486_s9 = sand.u32 1, %s768_s12  }
 0x18a   : > { %s487_s10 = scalar_lea.sflag [#allocation3], %s486_s9 }
 0x18b   : > { %p610_p9 = pnand %p616_p7, %p867_p8 }
 0x18d   : > { %759 = dma.done.wait (!%p610_p9), %s487_s10, 128  }
 0x18e   : > { %761 = vsyncadd (!%p610_p9), %s487_s10, 4294967168  ;;  %s496_s18 = scalar_lea.sflag [#allocation5], %s486_s9 }
 0x18f   : > { %763 = dma.done.wait (!%p610_p9), %s496_s18, 128  }
 0x190   : > { %765 = vsyncadd (!%p610_p9), %s496_s18, 4294967168  ;;  %s20_s17 = sadd.s32 1, %s788_s17   ;;  %s995_s12 = smov %s772_s13 }
 0x191   : > { %p17_p10 = scmp.ge.s32.totalorder %s20_s17, 4   ;;  %s996_s13 = smov %s776_s14 }
 0x192   : > { %s997_s14 = smov %s873_s25  ;;  %s998_s15 = smov %s784_s16 }
 0x193   : > { %s999_s16 = smov %s1001_s20  ;;  %19 = sbr.rel (!%p17_p10) target bundleno = 6 (0x6), region = 80 }
 0x19a   :  { %501 = vsyncpa [#allocation3], 1 }
 0x19b   :  { %503 = vsyncpa [#allocation3 + $0x1], 1 }
 0x19c   :  { %504 = vsyncpa [#allocation5], 1 }
 0x19d   :  { %506 = vsyncpa [#allocation5 + $0x1], 1 }

</bundles_post_ra>
